<compile_context>
chip_gen: v6e
topology: v6e:2x2x1
jax: 0.10.0
libtpu: 0.0.40
codegen_flags: <defaults>
</compile_context>

<pallas_src>
import functools

import jax
import jax.numpy as jnp
from jax.experimental import pallas as pl
from jax.experimental.pallas import tpu as pltpu


def _focal_loss_kernel(logits_ref, labels_ref, alpha_ref, out_ref, *,
                       gamma, n_valid, tile_n, tiles_per_chunk):
    ci = pl.program_id(0)          # "parallel" chunk axis (megacore)
    ti = pl.program_id(1)          # "arbitrary" accumulation axis

    @pl.when(ti == 0)
    def _init():
        out_ref[...] = jnp.zeros_like(out_ref)

    x = logits_ref[...].astype(jnp.float32)       # (TILE_N, C), cast in VMEM
    labels = labels_ref[...]                      # (TILE_N, 1) int32
    a = alpha_ref[...]                            # (1, C) f32 per-class weights

    tn, nc = x.shape

    # Logical (unclamped) global tile index -> global row ids for this block.
    g = ci * tiles_per_chunk + ti
    row_ids = jax.lax.broadcasted_iota(jnp.int32, (tn, 1), 0) + g * tile_n
    row_valid = row_ids < n_valid                                  # (TILE_N, 1) bool

    # Zero garbage rows of the implicit partial edge block BEFORE the softmax,
    # so inf/NaN can't be produced and poison the accumulator (NaN * 0 = NaN).
    x = jnp.where(row_valid, x, 0.0)

    # One-hot built in-kernel (VPU compare) — no (N, C) one-hot DMA'd from HBM.
    class_ids = jax.lax.broadcasted_iota(jnp.int32, (tn, nc), 1)
    onehot = (class_ids == labels).astype(jnp.float32)             # (TILE_N, C)

    # Numerically-stable log-softmax along the class (lane) axis.
    m = jnp.max(x, axis=-1, keepdims=True)                                # (TILE_N, 1)
    lse = jnp.log(jnp.sum(jnp.exp(x - m), axis=-1, keepdims=True)) + m    # (TILE_N, 1)
    logp = x - lse                                                        # (TILE_N, C)

    # Fused "gather": ce = -alpha[y] * logp[y] via a single lane reduce.
    ce = -jnp.sum(onehot * (a * logp), axis=-1, keepdims=True)            # (TILE_N, 1)

    pt = jnp.exp(-ce)
    d = 1.0 - pt
    if gamma == 0.0:
        mod = jnp.ones_like(d)
    elif gamma == 1.0:
        mod = d
    elif gamma == 2.0:
        mod = d * d                      # avoid lax.pow for the common case
    elif gamma == 3.0:
        mod = d * d * d
    else:
        mod = d ** gamma
    focal = mod * ce * row_valid.astype(jnp.float32)                      # (TILE_N, 1)

    # Accumulate directly into this chunk's resident output block (broadcast add).
    out_ref[...] += jnp.sum(focal)


def focal_loss(logits, labels, alpha=None, gamma=2.0, reduction="mean", tile_n=None):
    """Pallas focal loss. logits: (N, C) float (any dtype), labels: (N,) int."""
    n, c = logits.shape

    if alpha is None:
        alpha2d = jnp.ones((1, c), dtype=jnp.float32)
    else:
        alpha2d = jnp.asarray(alpha, dtype=jnp.float32).reshape(1, c)

    itemsize = jnp.dtype(logits.dtype).itemsize
    sublane = {4: 8, 2: 16, 1: 32}.get(itemsize, 8)   # packed-sublane multiple

    # Tiny-N corner only: pad up to one sublane group so a block never exceeds
    # the array along the second-minor dim.  (This is < sublane rows — the
    # general full-array jnp.pad from the previous version is gone.)
    labels = jnp.asarray(labels)
    if n < sublane:
        pad = sublane - n
        logits = jnp.pad(logits, ((0, pad), (0, 0)))
        labels = jnp.pad(labels, (0, pad))
        n_rows = sublane
    else:
        n_rows = n
    labels2d = labels.astype(jnp.int32).reshape(n_rows, 1)

    # --- per-generation VMEM budget -----------------------------------------
    try:
        vmem_cap = int(pltpu.get_tpu_info().vmem_capacity_bytes)
    except Exception:
        vmem_cap = 64 << 20                           # conservative (v7x per-TC)
    vmem_limit = int(min(vmem_cap * 3 // 4, 64 << 20))  # 48 MiB v7x, 64 MiB v5e/v6e

    # Budget the f32-sized working block (~10x headroom covers the double-buffered
    # input stream plus the live f32 intermediates of the softmax pipeline).
    f32_block_budget = max(1 << 20, vmem_limit // 10)
    if tile_n is None:
        tile_n = f32_block_budget // max(c * 4, 4)
    tile_n = max(sublane, (int(tile_n) // sublane) * sublane)
    tile_n = min(tile_n, max(sublane, (n_rows // sublane) * sublane))

    num_tiles = -(-n_rows // tile_n)
    num_chunks = 1 if num_tiles == 1 else 2           # "parallel" axis for megacore
    tiles_per_chunk = -(-num_tiles // num_chunks)

    def tile_map(ci, ti):
        # Clamp the physical block index; logical-overrun iterations are fully
        # masked in-kernel via row_ids >= n_valid.
        g = jnp.minimum(ci * tiles_per_chunk + ti, num_tiles - 1)
        return (g, 0)

    kernel = functools.partial(
        _focal_loss_kernel, gamma=float(gamma), n_valid=n,
        tile_n=tile_n, tiles_per_chunk=tiles_per_chunk)

    cost = pl.CostEstimate(
        flops=8 * n * c,
        transcendentals=n * c + 2 * n,
        bytes_accessed=n * c * itemsize + n * 4 + c * 4 + num_chunks * 8 * 128 * 4,
    )

    out = pl.pallas_call(
        kernel,
        out_shape=jax.ShapeDtypeStruct((num_chunks, 8, 128), jnp.float32),
        grid=(num_chunks, tiles_per_chunk),
        in_specs=[
            pl.BlockSpec((tile_n, c), tile_map),        # logits tile (native dtype)
            pl.BlockSpec((tile_n, 1), tile_map),        # int32 labels column
            pl.BlockSpec((1, c), lambda ci, ti: (0, 0)),  # per-class alpha (broadcast)
        ],
        out_specs=pl.BlockSpec((1, 8, 128), lambda ci, ti: (ci, 0, 0)),
        compiler_params=pltpu.CompilerParams(
            dimension_semantics=("parallel", "arbitrary"),
            vmem_limit_bytes=vmem_limit,
        ),
        cost_estimate=cost,
    )(logits, labels2d, alpha2d)

    total = jnp.sum(out[:, 0, 0])                     # tiny cross-chunk reduce in JAX
    if reduction == "mean":
        return total / n
    # TODO(synk): reduction='none' (per-sample output) not wired; 'mean'/'sum' only.
    return total


def _focal_loss_ref(logits, labels, alpha, gamma=2.0, reduction="mean"):
    """Pure-JAX reference (mirrors the PyTorch forward)."""
    n, c = logits.shape
    if alpha is None:
        alpha = jnp.ones((c,), dtype=jnp.float32)
    logp = jax.nn.log_softmax(logits.astype(jnp.float32), axis=-1)
    logp_y = jnp.take_along_axis(logp, labels[:, None], axis=-1)[:, 0]
    w_y = alpha[labels]
    ce = -w_y * logp_y
    pt = jnp.exp(-ce)
    focal = (1.0 - pt) ** gamma * ce
    return jnp.mean(focal) if reduction == "mean" else jnp.sum(focal)


if __name__ == "__main__":
    key = jax.random.PRNGKey(0)
    k1, k2, k3, k4, k5, k6 = jax.random.split(key, 6)

    # --- Test 1: small shapes, alpha weights, reduction='mean' ------------------
    N, C = 8, 16
    logits = jax.random.normal(k1, (N, C), dtype=jnp.float32) * 2.0
    labels = jax.random.randint(k2, (N,), 0, C, dtype=jnp.int32)
    alpha = jnp.linspace(0.5, 1.5, C, dtype=jnp.float32)

    out = focal_loss(logits, labels, alpha=alpha, gamma=2.0, reduction="mean")
    out = jax.block_until_ready(out)
    ref = _focal_loss_ref(logits, labels, alpha, gamma=2.0, reduction="mean")
    assert jnp.allclose(out, ref, rtol=1e-5, atol=1e-5), (out, ref)

    # --- Test 2: multi-tile / multi-chunk path with a partial edge block --------
    N2, C2 = 20, 16
    logits2 = jax.random.normal(k3, (N2, C2), dtype=jnp.float32) * 1.5
    labels2 = jax.random.randint(k4, (N2,), 0, C2, dtype=jnp.int32)

    # tile_n=8 forces 3 tiles across 2 "parallel" chunks + a masked edge block
    # and a clamped (fully masked) trailing grid step.
    out2 = focal_loss(logits2, labels2, alpha=None, gamma=2.0,
                      reduction="sum", tile_n=8)
    out2 = jax.block_until_ready(out2)
    ref2 = _focal_loss_ref(logits2, labels2, None, gamma=2.0, reduction="sum")
    assert jnp.allclose(out2, ref2, rtol=1e-5, atol=1e-5), (out2, ref2)

    # --- Test 3: bf16 logits (16-sublane packing path), default tiling ----------
    N3, C3 = 64, 16
    logits3 = (jax.random.normal(k5, (N3, C3), dtype=jnp.float32) * 2.0
               ).astype(jnp.bfloat16)
    labels3 = jax.random.randint(k6, (N3,), 0, C3, dtype=jnp.int32)

    out3 = focal_loss(logits3, labels3, alpha=alpha, gamma=2.0, reduction="mean")
    out3 = jax.block_until_ready(out3)
    ref3 = _focal_loss_ref(logits3, labels3, alpha, gamma=2.0, reduction="mean")
    assert jnp.allclose(out3, ref3, rtol=1e-4, atol=1e-4), (out3, ref3)

    print("KERNEL_OK")
</pallas_src>

<mosaic_0001>
module attributes {stable_mosaic.version = 11 : i64} {
  func.func @_focal_loss_kernel(%arg0: i32, %arg1: i32, %arg2: memref<8x16xf32, #tpu.memory_space<vmem>>, %arg3: memref<8x1xi32, #tpu.memory_space<vmem>>, %arg4: memref<1x16xf32, #tpu.memory_space<vmem>>, %arg5: memref<1x8x128xf32, #tpu.memory_space<vmem>>) attributes {dimension_semantics = [#tpu.dimension_semantics<parallel>, #tpu.dimension_semantics<arbitrary>], iteration_bounds = array<i64: 1, 1>, scalar_prefetch = 0 : i64, scratch_operands = 0 : i64, tpu.core_type = #tpu.core_type<tc>, window_params = [{transform_indices = @transform_0, window_bounds = array<i64: 8, 16>}, {transform_indices = @transform_1, window_bounds = array<i64: 8, 1>}, {pipeline_mode = #tpu.pipeline_mode<synchronous>, transform_indices = @transform_2, window_bounds = array<i64: 1, 16>}, {transform_indices = @transform_3, window_bounds = array<i64: 1, 8, 128>}]} {
    %c0_i32 = arith.constant 0 : i32
    %0 = arith.cmpi eq, %arg1, %c0_i32 : i32
    %1 = arith.extui %0 : i1 to i32
    %c0_i32_0 = arith.constant 0 : i32
    %2 = arith.cmpi ne, %1, %c0_i32_0 : i32
    scf.if %2 {
      %cst_20 = arith.constant 0.000000e+00 : f32
      %59 = vector.broadcast %cst_20 : f32 to vector<1x8x128xf32>
      %c0_21 = arith.constant 0 : index
      %c0_22 = arith.constant 0 : index
      %c0_23 = arith.constant 0 : index
      %60 = vector.load %arg5[%c0_21, %c0_22, %c0_23] : memref<1x8x128xf32, #tpu.memory_space<vmem>>, vector<1x8x128xf32>
      tpu.vector_store %arg5[%c0_21, %c0_22, %c0_23], %59 {strides = array<i32>} : memref<1x8x128xf32, #tpu.memory_space<vmem>>, vector<1x8x128xf32>,
    } else {
    }
    %c0 = arith.constant 0 : index
    %c0_1 = arith.constant 0 : index
    %3 = vector.load %arg2[%c0, %c0_1] : memref<8x16xf32, #tpu.memory_space<vmem>>, vector<8x16xf32>
    %c0_2 = arith.constant 0 : index
    %c0_3 = arith.constant 0 : index
    %4 = vector.load %arg3[%c0_2, %c0_3] : memref<8x1xi32, #tpu.memory_space<vmem>>, vector<8x1xi32>
    %c0_4 = arith.constant 0 : index
    %c0_5 = arith.constant 0 : index
    %5 = vector.load %arg4[%c0_4, %c0_5] : memref<1x16xf32, #tpu.memory_space<vmem>>, vector<1x16xf32>
    %c1_i32 = arith.constant 1 : i32
    %6 = arith.muli %arg0, %c1_i32 : i32
    %7 = arith.addi %6, %arg1 : i32
    %8 = tpu.iota {dimensions = array<i32: 0>} : vector<8x1xi32>
    %c8_i32 = arith.constant 8 : i32
    %9 = arith.muli %7, %c8_i32 : i32
    %10 = vector.broadcast %9 : i32 to vector<8x1xi32>
    %11 = arith.addi %8, %10 : vector<8x1xi32>
    %c8_i32_6 = arith.constant 8 : i32
    %12 = vector.broadcast %c8_i32_6 : i32 to vector<8x1xi32>
    %13 = arith.cmpi slt, %11, %12 : vector<8x1xi32>
    %cst = arith.constant 0.000000e+00 : f32
    %14 = vector.shape_cast %13 : vector<8x1xi1> to vector<8x1xi1>
    %15 = vector.broadcast %14 : vector<8x1xi1> to vector<8x16xi1>
    %16 = vector.broadcast %cst : f32 to vector<8x16xf32>
    %17 = arith.select %15, %3, %16 : vector<8x16xi1>, vector<8x16xf32>
    %18 = tpu.iota {dimensions = array<i32: 1>} : vector<8x16xi32>
    %19 = vector.broadcast %4 : vector<8x1xi32> to vector<8x16xi32>
    %20 = arith.cmpi eq, %18, %19 : vector<8x16xi32>
    %21 = arith.extui %20 : vector<8x16xi1> to vector<8x16xi32>
    %22 = arith.sitofp %21 : vector<8x16xi32> to vector<8x16xf32>
    %cst_7 = arith.constant dense<0xFF800000> : vector<8xf32>
    %23 = vector.multi_reduction <maximumf>, %17, %cst_7 [1] : vector<8x16xf32> to vector<8xf32>
    %24 = vector.shape_cast %23 : vector<8xf32> to vector<8x1xf32>
    %25 = vector.broadcast %24 : vector<8x1xf32> to vector<8x16xf32>
    %26 = arith.subf %17, %25 : vector<8x16xf32>
    %27 = math.exp %26 : vector<8x16xf32>
    %cst_8 = arith.constant dense<0.000000e+00> : vector<8xf32>
    %28 = vector.multi_reduction <add>, %27, %cst_8 [1] : vector<8x16xf32> to vector<8xf32>
    %29 = vector.shape_cast %28 : vector<8xf32> to vector<8x1xf32>
    %30 = math.log %29 : vector<8x1xf32>
    %31 = arith.addf %30, %24 : vector<8x1xf32>
    %32 = vector.broadcast %31 : vector<8x1xf32> to vector<8x16xf32>
    %33 = arith.subf %17, %32 : vector<8x16xf32>
    %34 = vector.broadcast %5 : vector<1x16xf32> to vector<8x16xf32>
    %35 = arith.mulf %34, %33 : vector<8x16xf32>
    %36 = arith.mulf %22, %35 : vector<8x16xf32>
    %cst_9 = arith.constant dense<0.000000e+00> : vector<8xf32>
    %37 = vector.multi_reduction <add>, %36, %cst_9 [1] : vector<8x16xf32> to vector<8xf32>
    %38 = vector.shape_cast %37 : vector<8xf32> to vector<8x1xf32>
    %cst_10 = arith.constant 0.000000e+00 : f32
    %39 = vector.broadcast %cst_10 : f32 to vector<8x1xf32>
    %40 = arith.subf %39, %38 : vector<8x1xf32>
    %cst_11 = arith.constant 0.000000e+00 : f32
    %41 = vector.broadcast %cst_11 : f32 to vector<8x1xf32>
    %42 = arith.subf %41, %40 : vector<8x1xf32>
    %43 = math.exp %42 : vector<8x1xf32>
    %cst_12 = arith.constant 1.000000e+00 : f32
    %44 = vector.broadcast %cst_12 : f32 to vector<8x1xf32>
    %45 = arith.subf %44, %43 : vector<8x1xf32>
    %46 = arith.mulf %45, %45 : vector<8x1xf32>
    %47 = arith.mulf %46, %40 : vector<8x1xf32>
    %48 = arith.extui %13 : vector<8x1xi1> to vector<8x1xi32>
    %49 = arith.sitofp %48 : vector<8x1xi32> to vector<8x1xf32>
    %50 = arith.mulf %47, %49 : vector<8x1xf32>
    %c0_13 = arith.constant 0 : index
    %c0_14 = arith.constant 0 : index
    %c0_15 = arith.constant 0 : index
    %51 = vector.load %arg5[%c0_13, %c0_14, %c0_15] : memref<1x8x128xf32, #tpu.memory_space<vmem>>, vector<1x8x128xf32>
    %52 = vector.shape_cast %50 : vector<8x1xf32> to vector<1x8x1xf32>
    %cst_16 = arith.constant dense<0.000000e+00> : vector<1xf32>
    %53 = vector.multi_reduction <add>, %52, %cst_16 [1, 2] : vector<1x8x1xf32> to vector<1xf32>
    %54 = vector.shape_cast %53 : vector<1xf32> to vector<1x1x1xf32>
    %55 = vector.extract %54[0, 0, 0] : f32 from vector<1x1x1xf32>
    %56 = vector.broadcast %55 : f32 to vector<1x8x128xf32>
    %57 = arith.addf %51, %56 : vector<1x8x128xf32>
    %c0_17 = arith.constant 0 : index
    %c0_18 = arith.constant 0 : index
    %c0_19 = arith.constant 0 : index
    %58 = vector.load %arg5[%c0_17, %c0_18, %c0_19] : memref<1x8x128xf32, #tpu.memory_space<vmem>>, vector<1x8x128xf32>
    tpu.vector_store %arg5[%c0_17, %c0_18, %c0_19], %57 {strides = array<i32>} : memref<1x8x128xf32, #tpu.memory_space<vmem>>, vector<1x8x128xf32>,
    return
  }
  func.func @transform_0(%arg0: i32, %arg1: i32) -> (i32, i32) {
    %c1_i32 = arith.constant 1 : i32
    %0 = arith.muli %arg0, %c1_i32 : i32
    %1 = arith.addi %0, %arg1 : i32
    %c0_i32 = arith.constant 0 : i32
    %2 = arith.minsi %1, %c0_i32 : i32
    %c0_i32_0 = arith.constant 0 : i32
    %c0_i32_1 = arith.constant 0 : i32
    return %2, %c0_i32_0 : i32, i32
  }
  func.func @transform_1(%arg0: i32, %arg1: i32) -> (i32, i32) {
    %c1_i32 = arith.constant 1 : i32
    %0 = arith.muli %arg0, %c1_i32 : i32
    %1 = arith.addi %0, %arg1 : i32
    %c0_i32 = arith.constant 0 : i32
    %2 = arith.minsi %1, %c0_i32 : i32
    %c0_i32_0 = arith.constant 0 : i32
    %c0_i32_1 = arith.constant 0 : i32
    return %2, %c0_i32_0 : i32, i32
  }
  func.func @transform_2(%arg0: i32, %arg1: i32) -> (i32, i32) {
    %c0_i32 = arith.constant 0 : i32
    %c0_i32_0 = arith.constant 0 : i32
    %c0_i32_1 = arith.constant 0 : i32
    return %c0_i32, %c0_i32_0 : i32, i32
  }
  func.func @transform_3(%arg0: i32, %arg1: i32) -> (i32, i32, i32) {
    %c0_i32 = arith.constant 0 : i32
    %c0_i32_0 = arith.constant 0 : i32
    %c0_i32_1 = arith.constant 0 : i32
    return %arg0, %c0_i32, %c0_i32_0 : i32, i32, i32
  }
}

</mosaic_0001>

<bundles_post_ra>
// kernel: tpu_custom_call.1
= control target key start
LH: loop header
LB: loop body
LE: loop exit
PB: predicated region body
PF: predicated region fallthrough
CT: control target
= control target key end

     0   :  { %vm95_vm0 = vcmask 130048   ;;  %s245_s0 = inlined_call_operand.vmem [shape: f32[8,16], index: 0, kind: input, shape index: {}]   ;;  %s246_s1 = inlined_call_operand.vmem [shape: s32[8,1], index: 1, kind: input, shape index: {}]   ;;  %s247_s2 = inlined_call_operand.vmem [shape: f32[1,16], index: 2, kind: input, shape index: {}]   ;;  %s248_s3 = inlined_call_operand.hbm [shape: f32[1,8,128], index: 3, kind: output, shape index: {}]  }
   0x1   :  { %v74_v0 = vld [vmem:[%s245_s0] sm:$0xff] }
   0x2   :  { %8 = vsyncpa [#allocation3], 0  ;;  %v96_v1 = vsel %vm95_vm0, %v74_v0, -inf  ;;  %v75_v2 = vld [vmem:[%s246_s1] sm:$0xff]  ;;  %v207_v3 = vmov 0   ;;  %v87_v10 = vlaneseq  ;;  %v208_v18 = vmov 0.0  }
   0x3   :  { %97 = vmax.xlane.f32.xlu0 %v96_v1  ;;  %177 = vset.pattern.permute.xlu1 %v207_v3  ;;  %v171_v16 = vld [vmem:[%s247_s2] ss:$0 sm:$0xff]  ;;  %vm130_vm2 = vcmask 7168   ;;  %s209_s2 = smov [#allocation2]  }
   0x4   :  { %178 = vset.pattern.permute.xlu0 %v207_v3  ;;  %90 = vperm.xlu1 %177, %v75_v2   ;;  %v88_v11 = vand.u32 127, %v87_v10  ;;  %s150_s16 = sshll.u32 %s209_s2, 4  ;;  %s151_s16 = int_to_ptr.vmem [resolvable:$true] %s150_s16 }
   0x5   :  { %s185_s18 = scalar_lea.vmem %s151_s16, 128  ;;  %p190_p1 = scmp.lt.s32.totalorder %s151_s16, %s151_s16 }
   0x6   :  { %p186_p0 = scmp.ne.s32.totalorder %s151_s16, %s185_s18  ;;  %p191_p2 = scmp.lt.s32.totalorder %s185_s18, %s185_s18 }
   0x8   :  { %p192_p3 = por %p191_p2, %p190_p1 }
   0xa   :  { %p193_p4 = pnand %p192_p3, %p186_p0 }
  0x7f   :  { %v91_v13 = vpop.permute.xlu1 %90 }
  0x80   :  { %vm92_vm1 = vcmp.eq.s32.totalorder %v88_v11, %v91_v13 }
  0x81   :  { %v170_v19 = vsel %vm92_vm1, 1.0, %v208_v18 }
  0x8c   :  { %v98_v4 = vpop.xlane.xlu0 %97 }
  0x8d   :  { %v99_v5 = vsub.f32 %v74_v0, %v98_v4 }
  0x8f   :  { %v100_v6 = vmul.f32 1.442695, %v99_v5 }
  0x91   :  { %179 = vpow2.f32 %v100_v6 }
  0x9e   :  { %v180_v7 = vpop.eup %179 }
  0x9f   :  { %v102_v8 = vsel %vm95_vm0, %v180_v7, 0.0 }
  0xa0   :  { %103 = vadd.xlane.f32.xlu0 %v102_v8 }
 0x129   :  { %v104_v9 = vpop.xlane.xlu0 %103 }
 0x12a   :  { %181 = vlog2.f32 %v104_v9 }
 0x137   :  { %v182_v12 = vpop.eup %181 }
 0x138   :  { %v106_v14 = vmul.f32 0.6931472, %v182_v12 }
 0x13a   :  { %v107_v15 = vadd.f32 %v106_v14, %v98_v4 }
 0x13c   :  { %v108_v17 = vsub.f32 %v74_v0, %v107_v15 }
 0x13e   :  { %v115_v20 = vmul.f32 %v171_v16, %v108_v17 }
 0x140   :  { %v116_v21 = vmul.f32 %v170_v19, %v115_v20 }
 0x142   :  { %v117_v22 = vsel %vm95_vm0, %v116_v21, 0.0 }
 0x143   :  { %118 = vadd.xlane.f32.xlu1 %v117_v22 }
 0x1cc   :  { %v119_v23 = vpop.xlane.xlu1 %118 }
 0x1cd   :  { %v120_v24 = vsub.f32 0.0, %v119_v23 }
 0x1cf   :  { %v121_v25 = vsub.f32 0.0, %v120_v24 }
 0x1d1   :  { %v122_v26 = vmul.f32 1.442695, %v121_v25 }
 0x1d3   :  { %183 = vpow2.f32 %v122_v26 }
 0x1e0   :  { %v184_v27 = vpop.eup %183 }
 0x1e1   :  { %v124_v28 = vsub.f32 1.0, %v184_v27 }
 0x1e3   :  { %v125_v29 = vmul.f32 %v124_v28, %v124_v28 }
 0x1e5   :  { %v126_v30 = vmul.f32 %v125_v29, %v120_v24 }
 0x1e7   :  { %v131_v31 = vsel %vm130_vm2, %v126_v30, 0.0 }
 0x1e8   :  { %132 = vadd.xlane.f32.xlu0 %v131_v31 }
 0x271   :  { %v133_v32 = vpop.xlane.xlu0 %132 }
 0x272   :  { %v134_v33 = vrot.slane %v133_v32, 4 }
 0x274   :  { %v135_v34 = vadd.f32 %v134_v33, %v133_v32 }
 0x276   :  { %v136_v35 = vrot.slane %v135_v34, 2 }
 0x278   :  { %v137_v36 = vadd.f32 %v136_v35, %v135_v34 }
 0x27a   :  { %v138_v37 = vrot.slane %v137_v36, 1 }
 0x27c   :  { %v139_v38 = vadd.f32 %v138_v37, %v137_v36 }
 0x27e   :  { %172 = vpush %v139_v38 }
 0x2af   :  { %s173_s17 = spop %172 }
 0x2b0   :  { %v141_v39 = vstv %s173_s17 }
 0x2b1   :  { %143 = vst [vmem:[#allocation2] sm:$0xff] %v141_v39 }
 0x2b2   :  { %196 = shalt.err (!%p193_p4)
}
 0x2b3   :  { %153 = dma.vmem_to_hbm [thread:$0]  %s151_s16, 128, %s248_s3, [#allocation3]  }
 0x2b4   :  { %205 = dma.done.wait [#allocation3], 128  }
 0x2b5   :  { %206 = vsyncadd [#allocation3], 4294967168 }
 0x2b6   :  { %157 = vsyncpa [#allocation3], 1 }

</bundles_post_ra>
